<compile_context>
chip_gen: v6e
topology: v6e:2x2x1
jax: 0.10.0
libtpu: 0.0.40
codegen_flags: <defaults>
</compile_context>

<pallas_src>
import functools

import numpy as np
import jax
import jax.numpy as jnp
from jax import lax
from jax.experimental import pallas as pl
from jax.experimental.pallas import tpu as pltpu


def _round_up(x, m):
    return (x + m - 1) // m * m


def _center_loss_kernel(d_row_ref, h_ref, center_ref,
                        loss_ref, new_center_ref,
                        sums_acc, counts_acc, hh_acc,
                        *, alpha, inv_bf):
    b = pl.program_id(1)                        # batch (reduction) axis, innermost

    @pl.when(b == 0)
    def _init():
        sums_acc[...] = jnp.zeros_like(sums_acc)
        counts_acc[...] = jnp.zeros_like(counts_acc)
        hh_acc[...] = jnp.zeros_like(hh_acc)

    h = h_ref[...]                              # [bt, ft] native dtype (f32 or bf16)
    d_row = d_row_ref[...]                      # [1, bt]  int32 (padded entries hold -1)

    C = sums_acc.shape[0]
    bt = h.shape[0]

    # Column-layout one-hot built directly from an iota compare (VPU; no XLU transpose).
    cls_cb = lax.broadcasted_iota(jnp.int32, (C, bt), 0)
    one_hot = d_row == cls_cb                   # [C, bt] bool

    # Per-class feature sums on the MXU with f32 accumulation.
    sums_acc[...] += jnp.dot(one_hot.astype(h.dtype), h,
                             preferred_element_type=jnp.float32)         # [C, ft]
    # Per-class counts: plain lane (XLU) reduce.
    counts_acc[...] += jnp.sum(one_hot.astype(jnp.float32), axis=1, keepdims=True)

    # Lane-wide sum-of-squares partial (sublane reduce per step; the cross-lane reduce
    # is deferred to finalize).  Padded rows are zero and contribute nothing.
    hf = h.astype(jnp.float32)
    hh_acc[...] += jnp.sum(hf * hf, axis=0, keepdims=True)               # [1, ft]

    @pl.when(b == pl.num_programs(1) - 1)
    def _finalize():
        center = center_ref[...]                # [C, ft] f32 (resident block)
        sums = sums_acc[...]
        counts = counts_acc[...]
        present = counts > 0.0
        safe = jnp.where(present, counts, 1.0)

        # Center update: diff[k] = mean_{i: d==k}(h_i) - center[k] for present classes.
        diff = jnp.where(present, sums / safe - center, 0.0)
        new_center_ref[...] = (center + alpha * diff).astype(new_center_ref.dtype)

        # Algebraic loss for this feature tile:
        #   Σ_i ||h_i - c_{d_i}||² = Σ||h||² - 2 Σ_k⟨sums_k, c_k⟩ + Σ_k counts_k ||c_k||²
        hh = jnp.sum(hh_acc[...])
        cross = jnp.sum(sums * center)
        cc = jnp.sum(counts * jnp.sum(center * center, axis=1, keepdims=True))
        loss_ref[0, 0] = (hh - 2.0 * cross + cc) * inv_bf


def center_loss(h, d, center, alpha=0.1, tile_bytes=4 << 20, split_features=True):
    """Returns (loss_center: scalar f32, new_center: [C, F] f32).

    h: [B, F] (f32 or bf16), d: [B] int labels, center: [C, F].
    The batch axis is streamed in byte-sized tiles ("arbitrary" grid axis); the feature
    axis is optionally split in two ("parallel" grid axis, v7x megacore); center stays
    VMEM-resident per feature tile.
    """
    B, F = h.shape
    C, Fc = center.shape
    assert F == Fc

    center_f32 = center.astype(jnp.float32)
    itemsize = h.dtype.itemsize

    # Feature split across the two v7x TensorCores (each half must stay lane-aligned).
    if split_features and F >= 256 and F % 256 == 0:
        n_f, ft = 2, F // 2
    else:
        n_f, ft = 1, F

    # Batch tile sized in bytes (~tile_bytes of h per grid step).  When more than one
    # step is needed the tile must be lane-aligned (multiple of 128) for the [1, bt]
    # label block; a single step may use the full (8-aligned) batch.
    B8 = _round_up(B, 8)
    if B8 * ft * itemsize <= tile_bytes:
        bt = B8
    else:
        rows_target = max(8, tile_bytes // max(1, ft * itemsize))
        bt = min(_round_up(rows_target, 128), _round_up(B8, 128))
        bt = max(bt, 128)
    B_pad = _round_up(B, bt)
    pad_b = B_pad - B
    n_b = B_pad // bt

    h_p = h if pad_b == 0 else jnp.pad(h, ((0, pad_b), (0, 0)))
    d_i32 = d.astype(jnp.int32)
    d_p = d_i32 if pad_b == 0 else jnp.pad(d_i32, (0, pad_b), constant_values=-1)
    d_row = d_p.reshape(1, B_pad)

    kernel = functools.partial(_center_loss_kernel,
                               alpha=float(alpha),
                               inv_bf=1.0 / float(B * F))

    # Explicit VMEM budget (double-buffered h tile + resident center/sums/new_center
    # blocks + one-hot / f32 temporaries), clamped for v7x's 64 MiB physical VMEM.
    est = (2 * bt * ft * itemsize          # double-buffered h tile
           + 2 * max(bt, 128) * 4          # label row (double-buffered, lane-padded)
           + 4 * C * ft * 4                # center in + new_center out + sums_acc
           + 3 * bt * ft * 4               # f32 temporaries on the squared path
           + 2 * C * max(bt, 128) * 4      # one-hot tile
           + (2 << 20))                    # slack
    vmem_limit = int(min(max(est, 16 << 20), 48 << 20))

    loss_parts, new_center = pl.pallas_call(
        kernel,
        out_shape=(jax.ShapeDtypeStruct((1, n_f), jnp.float32),
                   jax.ShapeDtypeStruct((C, F), jnp.float32)),
        grid_spec=pltpu.PrefetchScalarGridSpec(
            num_scalar_prefetch=0,
            grid=(n_f, n_b),
            in_specs=[
                pl.BlockSpec((1, bt), lambda f, b: (0, b)),     # labels  [1, B_pad] int32
                pl.BlockSpec((bt, ft), lambda f, b: (b, f)),    # h       [B_pad, F] (streamed)
                pl.BlockSpec((C, ft), lambda f, b: (0, f)),     # center  [C, F] (resident per f)
            ],
            out_specs=(
                pl.BlockSpec((1, 1), lambda f, b: (0, f),
                             memory_space=pltpu.MemorySpace.SMEM),   # per-f-tile loss partial
                pl.BlockSpec((C, ft), lambda f, b: (0, f)),          # new_center
            ),
            scratch_shapes=[
                pltpu.VMEM((C, ft), jnp.float32),   # per-class feature sums
                pltpu.VMEM((C, 1), jnp.float32),    # per-class counts
                pltpu.VMEM((1, ft), jnp.float32),   # lane-wide sum(h^2) partial
            ],
        ),
        input_output_aliases={2: 1},                 # center -> new_center (no extra HBM buffer)
        compiler_params=pltpu.CompilerParams(
            dimension_semantics=("parallel", "arbitrary"),
            vmem_limit_bytes=vmem_limit),
    )(d_row, h_p, center_f32)

    return jnp.sum(loss_parts), new_center


def center_loss_ref(h, d, center, alpha=0.1):
    """Pure numpy reference matching the PyTorch forward."""
    h = np.asarray(h, np.float32)
    d = np.asarray(d, np.int32)
    center = np.asarray(center, np.float32)
    batch_center = center[d]
    loss = np.mean((h - batch_center) ** 2)
    diff = np.zeros_like(center)
    for k in np.unique(d):
        diff[k] = (h[d == k] - center[k]).mean(axis=0)
    new_center = center + alpha * diff
    return loss, new_center


if __name__ == "__main__":
    alpha = 0.1

    # --- test 1: module-consistent small shapes (single tile, n_f == 1) ---------------
    B, n_feature, n_class = 8, 32, 4
    key = jax.random.PRNGKey(0)
    kh, kd = jax.random.split(key)
    h = jax.random.normal(kh, (B, n_feature), dtype=jnp.float32)
    d = jax.random.randint(kd, (B,), 0, n_class, dtype=jnp.int32)
    # Module __init__: register_buffer('center', torch.zeros([n_class, n_feature]))
    center = jnp.zeros((n_class, n_feature), dtype=jnp.float32)

    loss1, center1 = center_loss(h, d, center, alpha)          # step 1: zero centers
    loss2, center2 = center_loss(h, d, center1, alpha)         # step 2: non-trivial centers
    jax.block_until_ready((loss1, center1, loss2, center2))

    ref_loss1, ref_center1 = center_loss_ref(h, d, center, alpha)
    ref_loss2, ref_center2 = center_loss_ref(h, d, ref_center1, alpha)
    assert np.allclose(np.asarray(loss1), ref_loss1, rtol=1e-4, atol=1e-5)
    assert np.allclose(np.asarray(center1), ref_center1, rtol=1e-4, atol=1e-5)
    assert np.allclose(np.asarray(loss2), ref_loss2, rtol=1e-4, atol=1e-5)
    assert np.allclose(np.asarray(center2), ref_center2, rtol=1e-4, atol=1e-5)

    # --- test 2: multi-step batch grid + padding (B=200 -> 2 tiles of 128, labels -1) --
    B2, F2, C2 = 200, 48, 10
    k1, k2, k3 = jax.random.split(jax.random.PRNGKey(0), 3)
    h2 = jax.random.normal(k1, (B2, F2), dtype=jnp.float32)
    d2 = jax.random.randint(k2, (B2,), 0, C2, dtype=jnp.int32)
    c2 = jax.random.normal(k3, (C2, F2), dtype=jnp.float32) * 0.1
    loss_g, center_g = center_loss(h2, d2, c2, alpha=0.05, tile_bytes=128 * F2 * 4)
    jax.block_until_ready((loss_g, center_g))
    ref_loss_g, ref_center_g = center_loss_ref(h2, d2, c2, alpha=0.05)
    assert np.allclose(np.asarray(loss_g), ref_loss_g, rtol=1e-4, atol=1e-5)
    assert np.allclose(np.asarray(center_g), ref_center_g, rtol=1e-4, atol=1e-5)

    # --- test 3: feature split across the "parallel" axis (F=256 -> two 128-wide tiles) -
    B3, F3, C3 = 64, 256, 6
    k4, k5, k6 = jax.random.split(jax.random.PRNGKey(1), 3)
    h3 = jax.random.normal(k4, (B3, F3), dtype=jnp.float32)
    d3 = jax.random.randint(k5, (B3,), 0, C3, dtype=jnp.int32)
    c3 = jax.random.normal(k6, (C3, F3), dtype=jnp.float32) * 0.2
    loss_s, center_s = center_loss(h3, d3, c3, alpha=0.1)
    jax.block_until_ready((loss_s, center_s))
    ref_loss_s, ref_center_s = center_loss_ref(h3, d3, c3, alpha=0.1)
    assert np.allclose(np.asarray(loss_s), ref_loss_s, rtol=1e-4, atol=1e-5)
    assert np.allclose(np.asarray(center_s), ref_center_s, rtol=1e-4, atol=1e-5)

    print("KERNEL_OK")
</pallas_src>

<mosaic_0001>
module attributes {stable_mosaic.version = 11 : i64} {
  func.func @_center_loss_kernel(%arg0: i32, %arg1: i32, %arg2: memref<1x8xi32, #tpu.memory_space<vmem>>, %arg3: memref<8x32xf32, #tpu.memory_space<vmem>>, %arg4: memref<4x32xf32, #tpu.memory_space<vmem>>, %arg5: memref<1x1xf32, #tpu.memory_space<smem>>, %arg6: memref<4x32xf32, #tpu.memory_space<vmem>>, %arg7: memref<4x32xf32, #tpu.memory_space<vmem>>, %arg8: memref<4x1xf32, #tpu.memory_space<vmem>>, %arg9: memref<1x32xf32, #tpu.memory_space<vmem>>) attributes {dimension_semantics = [#tpu.dimension_semantics<parallel>, #tpu.dimension_semantics<arbitrary>], iteration_bounds = array<i64: 1, 1>, scalar_prefetch = 0 : i64, scratch_operands = 3 : i64, tpu.core_type = #tpu.core_type<tc>, window_params = [{transform_indices = @transform_0, window_bounds = array<i64: 1, 8>}, {transform_indices = @transform_1, window_bounds = array<i64: 8, 32>}, {transform_indices = @transform_2, window_bounds = array<i64: 4, 32>}, {transform_indices = @transform_3, window_bounds = array<i64: 1, 1>}, {transform_indices = @transform_4, window_bounds = array<i64: 4, 32>}]} {
    %c0_i32 = arith.constant 0 : i32
    %0 = arith.cmpi eq, %arg1, %c0_i32 : i32
    %1 = arith.extui %0 : i1 to i32
    %c0_i32_0 = arith.constant 0 : i32
    %2 = arith.cmpi ne, %1, %c0_i32_0 : i32
    scf.if %2 {
      %cst_20 = arith.constant 0.000000e+00 : f32
      %30 = vector.broadcast %cst_20 : f32 to vector<4x32xf32>
      %c0_21 = arith.constant 0 : index
      %c0_22 = arith.constant 0 : index
      %31 = vector.load %arg7[%c0_21, %c0_22] : memref<4x32xf32, #tpu.memory_space<vmem>>, vector<4x32xf32>
      tpu.vector_store %arg7[%c0_21, %c0_22], %30 {strides = array<i32>} : memref<4x32xf32, #tpu.memory_space<vmem>>, vector<4x32xf32>,
      %cst_23 = arith.constant 0.000000e+00 : f32
      %32 = vector.broadcast %cst_23 : f32 to vector<4x1xf32>
      %c0_24 = arith.constant 0 : index
      %c0_25 = arith.constant 0 : index
      %33 = vector.load %arg8[%c0_24, %c0_25] : memref<4x1xf32, #tpu.memory_space<vmem>>, vector<4x1xf32>
      tpu.vector_store %arg8[%c0_24, %c0_25], %32 {strides = array<i32>} : memref<4x1xf32, #tpu.memory_space<vmem>>, vector<4x1xf32>,
      %cst_26 = arith.constant 0.000000e+00 : f32
      %34 = vector.broadcast %cst_26 : f32 to vector<1x32xf32>
      %c0_27 = arith.constant 0 : index
      %c0_28 = arith.constant 0 : index
      %35 = vector.load %arg9[%c0_27, %c0_28] : memref<1x32xf32, #tpu.memory_space<vmem>>, vector<1x32xf32>
      tpu.vector_store %arg9[%c0_27, %c0_28], %34 {strides = array<i32>} : memref<1x32xf32, #tpu.memory_space<vmem>>, vector<1x32xf32>,
    } else {
    }
    %c0 = arith.constant 0 : index
    %c0_1 = arith.constant 0 : index
    %3 = vector.load %arg3[%c0, %c0_1] : memref<8x32xf32, #tpu.memory_space<vmem>>, vector<8x32xf32>
    %c0_2 = arith.constant 0 : index
    %c0_3 = arith.constant 0 : index
    %4 = vector.load %arg2[%c0_2, %c0_3] : memref<1x8xi32, #tpu.memory_space<vmem>>, vector<1x8xi32>
    %5 = tpu.iota {dimensions = array<i32: 0>} : vector<4x8xi32>
    %6 = vector.broadcast %4 : vector<1x8xi32> to vector<4x8xi32>
    %7 = arith.cmpi eq, %6, %5 : vector<4x8xi32>
    %c0_4 = arith.constant 0 : index
    %c0_5 = arith.constant 0 : index
    %8 = vector.load %arg7[%c0_4, %c0_5] : memref<4x32xf32, #tpu.memory_space<vmem>>, vector<4x32xf32>
    %9 = arith.extui %7 : vector<4x8xi1> to vector<4x8xi32>
    %10 = arith.sitofp %9 : vector<4x8xi32> to vector<4x8xf32>
    %cst = arith.constant dense<0.000000e+00> : vector<4x32xf32>
    %11 = tpu.matmul %10, %3, %cst {dimension_numbers = #tpu.dot_dimension_numbers<[1], [0], [0], [1], [0, 0, 1, 1], [], []>} : vector<4x8xf32>, vector<8x32xf32>, vector<4x32xf32> -> vector<4x32xf32>
    %12 = arith.addf %8, %11 : vector<4x32xf32>
    %c0_6 = arith.constant 0 : index
    %c0_7 = arith.constant 0 : index
    %13 = vector.load %arg7[%c0_6, %c0_7] : memref<4x32xf32, #tpu.memory_space<vmem>>, vector<4x32xf32>
    tpu.vector_store %arg7[%c0_6, %c0_7], %12 {strides = array<i32>} : memref<4x32xf32, #tpu.memory_space<vmem>>, vector<4x32xf32>,
    %c0_8 = arith.constant 0 : index
    %c0_9 = arith.constant 0 : index
    %14 = vector.load %arg8[%c0_8, %c0_9] : memref<4x1xf32, #tpu.memory_space<vmem>>, vector<4x1xf32>
    %15 = arith.extui %7 : vector<4x8xi1> to vector<4x8xi32>
    %16 = arith.sitofp %15 : vector<4x8xi32> to vector<4x8xf32>
    %cst_10 = arith.constant dense<0.000000e+00> : vector<4xf32>
    %17 = vector.multi_reduction <add>, %16, %cst_10 [1] : vector<4x8xf32> to vector<4xf32>
    %18 = vector.shape_cast %17 : vector<4xf32> to vector<4x1xf32>
    %19 = arith.addf %14, %18 : vector<4x1xf32>
    %c0_11 = arith.constant 0 : index
    %c0_12 = arith.constant 0 : index
    %20 = vector.load %arg8[%c0_11, %c0_12] : memref<4x1xf32, #tpu.memory_space<vmem>>, vector<4x1xf32>
    tpu.vector_store %arg8[%c0_11, %c0_12], %19 {strides = array<i32>} : memref<4x1xf32, #tpu.memory_space<vmem>>, vector<4x1xf32>,
    %c0_13 = arith.constant 0 : index
    %c0_14 = arith.constant 0 : index
    %21 = vector.load %arg9[%c0_13, %c0_14] : memref<1x32xf32, #tpu.memory_space<vmem>>, vector<1x32xf32>
    %22 = arith.mulf %3, %3 : vector<8x32xf32>
    %cst_15 = arith.constant dense<0.000000e+00> : vector<32xf32>
    %23 = vector.multi_reduction <add>, %22, %cst_15 [0] : vector<8x32xf32> to vector<32xf32>
    %24 = vector.shape_cast %23 : vector<32xf32> to vector<1x32xf32>
    %25 = arith.addf %21, %24 : vector<1x32xf32>
    %c0_16 = arith.constant 0 : index
    %c0_17 = arith.constant 0 : index
    %26 = vector.load %arg9[%c0_16, %c0_17] : memref<1x32xf32, #tpu.memory_space<vmem>>, vector<1x32xf32>
    tpu.vector_store %arg9[%c0_16, %c0_17], %25 {strides = array<i32>} : memref<1x32xf32, #tpu.memory_space<vmem>>, vector<1x32xf32>,
    %c0_i32_18 = arith.constant 0 : i32
    %27 = arith.cmpi eq, %arg1, %c0_i32_18 : i32
    %28 = arith.extui %27 : i1 to i32
    %c0_i32_19 = arith.constant 0 : i32
    %29 = arith.cmpi ne, %28, %c0_i32_19 : i32
    scf.if %29 {
      %c0_20 = arith.constant 0 : index
      %c0_21 = arith.constant 0 : index
      %30 = vector.load %arg4[%c0_20, %c0_21] : memref<4x32xf32, #tpu.memory_space<vmem>>, vector<4x32xf32>
      %c0_22 = arith.constant 0 : index
      %c0_23 = arith.constant 0 : index
      %31 = vector.load %arg7[%c0_22, %c0_23] : memref<4x32xf32, #tpu.memory_space<vmem>>, vector<4x32xf32>
      %c0_24 = arith.constant 0 : index
      %c0_25 = arith.constant 0 : index
      %32 = vector.load %arg8[%c0_24, %c0_25] : memref<4x1xf32, #tpu.memory_space<vmem>>, vector<4x1xf32>
      %cst_26 = arith.constant 0.000000e+00 : f32
      %33 = vector.broadcast %cst_26 : f32 to vector<4x1xf32>
      %34 = arith.cmpf ogt, %32, %33 : vector<4x1xf32>
      %cst_27 = arith.constant 1.000000e+00 : f32
      %35 = vector.broadcast %cst_27 : f32 to vector<4x1xf32>
      %36 = arith.select %34, %32, %35 : vector<4x1xi1>, vector<4x1xf32>
      %37 = vector.broadcast %36 : vector<4x1xf32> to vector<4x32xf32>
      %38 = arith.divf %31, %37 : vector<4x32xf32>
      %39 = arith.subf %38, %30 : vector<4x32xf32>
      %cst_28 = arith.constant 0.000000e+00 : f32
      %40 = vector.shape_cast %34 : vector<4x1xi1> to vector<4x1xi1>
      %41 = vector.broadcast %40 : vector<4x1xi1> to vector<4x32xi1>
      %42 = vector.broadcast %cst_28 : f32 to vector<4x32xf32>
      %43 = arith.select %41, %39, %42 : vector<4x32xi1>, vector<4x32xf32>
      %cst_29 = arith.constant 1.000000e-01 : f32
      %44 = vector.broadcast %cst_29 : f32 to vector<4x32xf32>
      %45 = arith.mulf %44, %43 : vector<4x32xf32>
      %46 = arith.addf %30, %45 : vector<4x32xf32>
      %c0_30 = arith.constant 0 : index
      %c0_31 = arith.constant 0 : index
      %47 = vector.load %arg6[%c0_30, %c0_31] : memref<4x32xf32, #tpu.memory_space<vmem>>, vector<4x32xf32>
      tpu.vector_store %arg6[%c0_30, %c0_31], %46 {strides = array<i32>} : memref<4x32xf32, #tpu.memory_space<vmem>>, vector<4x32xf32>,
      %c0_32 = arith.constant 0 : index
      %c0_33 = arith.constant 0 : index
      %48 = vector.load %arg9[%c0_32, %c0_33] : memref<1x32xf32, #tpu.memory_space<vmem>>, vector<1x32xf32>
      %49 = vector.shape_cast %48 : vector<1x32xf32> to vector<1x1x32xf32>
      %cst_34 = arith.constant dense<0.000000e+00> : vector<1xf32>
      %50 = vector.multi_reduction <add>, %49, %cst_34 [1, 2] : vector<1x1x32xf32> to vector<1xf32>
      %51 = vector.shape_cast %50 : vector<1xf32> to vector<1x1x1xf32>
      %52 = vector.extract %51[0, 0, 0] : f32 from vector<1x1x1xf32>
      %53 = arith.mulf %31, %30 : vector<4x32xf32>
      %54 = vector.shape_cast %53 : vector<4x32xf32> to vector<1x4x32xf32>
      %cst_35 = arith.constant dense<0.000000e+00> : vector<1xf32>
      %55 = vector.multi_reduction <add>, %54, %cst_35 [1, 2] : vector<1x4x32xf32> to vector<1xf32>
      %56 = vector.shape_cast %55 : vector<1xf32> to vector<1x1x1xf32>
      %57 = vector.extract %56[0, 0, 0] : f32 from vector<1x1x1xf32>
      %58 = arith.mulf %30, %30 : vector<4x32xf32>
      %cst_36 = arith.constant dense<0.000000e+00> : vector<4xf32>
      %59 = vector.multi_reduction <add>, %58, %cst_36 [1] : vector<4x32xf32> to vector<4xf32>
      %60 = vector.shape_cast %59 : vector<4xf32> to vector<4x1xf32>
      %61 = arith.mulf %32, %60 : vector<4x1xf32>
      %62 = vector.shape_cast %61 : vector<4x1xf32> to vector<1x4x1xf32>
      %cst_37 = arith.constant dense<0.000000e+00> : vector<1xf32>
      %63 = vector.multi_reduction <add>, %62, %cst_37 [1, 2] : vector<1x4x1xf32> to vector<1xf32>
      %64 = vector.shape_cast %63 : vector<1xf32> to vector<1x1x1xf32>
      %65 = vector.extract %64[0, 0, 0] : f32 from vector<1x1x1xf32>
      %cst_38 = arith.constant 2.000000e+00 : f32
      %66 = arith.mulf %cst_38, %57 : f32
      %67 = arith.subf %52, %66 : f32
      %68 = arith.addf %67, %65 : f32
      %cst_39 = arith.constant 3.906250e-03 : f32
      %69 = arith.mulf %68, %cst_39 : f32
      %c0_40 = arith.constant 0 : index
      %c0_41 = arith.constant 0 : index
      %70 = memref.load %arg5[%c0_40, %c0_41] : memref<1x1xf32, #tpu.memory_space<smem>>
      memref.store %69, %arg5[%c0_40, %c0_41] : memref<1x1xf32, #tpu.memory_space<smem>>
    } else {
    }
    return
  }
  func.func @transform_0(%arg0: i32, %arg1: i32) -> (i32, i32) {
    %c0_i32 = arith.constant 0 : i32
    %c0_i32_0 = arith.constant 0 : i32
    return %c0_i32, %arg1 : i32, i32
  }
  func.func @transform_1(%arg0: i32, %arg1: i32) -> (i32, i32) {
    %c0_i32 = arith.constant 0 : i32
    return %arg1, %arg0 : i32, i32
  }
  func.func @transform_2(%arg0: i32, %arg1: i32) -> (i32, i32) {
    %c0_i32 = arith.constant 0 : i32
    %c0_i32_0 = arith.constant 0 : i32
    return %c0_i32, %arg0 : i32, i32
  }
  func.func @transform_3(%arg0: i32, %arg1: i32) -> (i32, i32) {
    %c0_i32 = arith.constant 0 : i32
    %c0_i32_0 = arith.constant 0 : i32
    return %c0_i32, %arg0 : i32, i32
  }
  func.func @transform_4(%arg0: i32, %arg1: i32) -> (i32, i32) {
    %c0_i32 = arith.constant 0 : i32
    %c0_i32_0 = arith.constant 0 : i32
    return %c0_i32, %arg0 : i32, i32
  }
}

</mosaic_0001>

<bundles_post_ra>
// kernel: tpu_custom_call.1
= control target key start
LH: loop header
LB: loop body
LE: loop exit
PB: predicated region body
PF: predicated region fallthrough
CT: control target
= control target key end

     0   :  { %10 = vsyncpa [#allocation6], 0  ;;  %s389_s0 = inlined_call_operand.vmem [shape: s32[1,8], index: 0, kind: input, shape index: {}]   ;;  %s390_s1 = inlined_call_operand.vmem [shape: f32[8,32], index: 1, kind: input, shape index: {}]   ;;  %s391_s2 = inlined_call_operand.hbm [shape: f32[4,32], index: 2, kind: input, shape index: {}, may-alias: {2,4}]   ;;  %s392_s3 = inlined_call_operand.hbm [shape: f32[1,1], index: 3, kind: output, shape index: {0}]   ;;  %s393_s4 = inlined_call_operand.hbm [shape: f32[4,32], index: 4, kind: output, shape index: {1}, may-alias: {2,4}]  }
   0x1   :  { %11 = vsyncpa [#allocation8], 0 }
   0x2   :  { %12 = vsyncpa [#allocation7], 0  ;;  %s326_s15 = smov [#allocation5]  }
   0x3   :  { %s23_s16 = sshll.u32 %s326_s15, 4  ;;  %s24_s16 = int_to_ptr.vmem [resolvable:$true] %s23_s16 }
   0x4   :  { %s280_s17 = scalar_lea.vmem %s24_s16, 64  ;;  %p285_p1 = scmp.lt.s32.totalorder %s24_s16, %s24_s16 }
   0x5   :  { %p281_p0 = scmp.ne.s32.totalorder %s24_s16, %s280_s17  ;;  %p286_p2 = scmp.lt.s32.totalorder %s280_s17, %s280_s17 }
   0x7   :  { %p287_p3 = por %p286_p2, %p285_p1 }
   0x9   :  { %p288_p4 = pnand %p287_p3, %p281_p0 }
   0xb   :  { %291 = shalt.err (!%p288_p4)
}
   0xc   :  { %26 = dma.hbm_to_vmem [thread:$0]  %s391_s2, 64, %s24_s16, [#allocation6]  }
   0xd   :  { %320 = dma.done.wait [#allocation6], 64  }
   0xe   :  { %321 = vsyncadd [#allocation6], 4294967232  ;;  %v42_v0 = vlaneseq  ;;  %v327_v1 = vmov 0.0   ;;  %vm328_vm0 = vmmov 0   ;;  %vm34_vm1 = vcmask 257024   ;;  %v40_v3 = vld [vmem:[%s390_s1] sm:$0xff] }
   0xf   :  { %251 = vmatprep.subr.mxu0 %v327_v1  ;;  %253 = vmatprep.mubr.msk.f32.mxu0 %vm328_vm0, %v327_v1  ;;  %vm36_vm2 = vcmask 3072   ;;  %35 = vst.msk [vmem:[#allocation2] sm:$0xf] %vm34_vm1, %v327_v1  ;;  %vm52_vm3 = vcmask 64512   ;;  %v246_v4 = vld [vmem:[%s389_s0] ss:$0 sm:$0xff]  ;;  %v138_v10 = vmul.f32 %v40_v3, %v40_v3 }
  0x10   :  { %37 = vst.msk [vmem:[#allocation3] sm:$0xf] %vm36_vm2, %v327_v1  ;;  %v43_v2 = vshrl.u32 %v42_v0, 7  ;;  %vm130_vm4 = vcmask 60416   ;;  %v368_v5 = vld [vmem:[#allocation5] sm:$0xf]  ;;  %252 = vmatpush3.msra.mxu0 %v40_v3 }
  0x11   :  { %v197_v6 = vmul.f32 %v368_v5, %v368_v5  ;;  %vm139_vm6 = vcmask 261120   ;;  %vm38_vm7 = vcmask 253952   ;;  %v329_v22 = vmov 0   ;;  %s330_s0 = smov [#allocation10]  }
  0x12   :  { %vm48_vm5 = vcmp.eq.s32.totalorder %v246_v4, %v43_v2  ;;  %v140_v11 = vsel %vm139_vm6, %v138_v10, 0.0  ;;  %39 = vst.msk [vmem:[#allocation4] sm:$0x1] %vm38_vm7, %v327_v1  ;;  %269 = vset.pattern.permute.xlu0 %v329_v22  ;;  %268 = vset.pattern.permute.xlu1 %v329_v22  ;;  %s232_s1 = sshll.u32 %s330_s0, 4  ;;  %s233_s1 = int_to_ptr.vmem [resolvable:$true] %s232_s1 }
  0x13   :  { %v247_v7 = vsel %vm48_vm5, 1.0, %v327_v1  ;;  %v198_v9 = vsel %vm34_vm1, %v197_v6, 0.0  ;;  %v141_v12 = vrot.slane %v140_v11, 4  ;;  %s292_s23 = scalar_lea.vmem %s233_s1, 64  ;;  %p297_p6 = scmp.lt.s32.totalorder %s233_s1, %s233_s1 }
  0x14   :  { %254 = vmatmul.mubr.msk.f32.vlgmr.msra.gmra.mxu0 %vm52_vm3, %v247_v7  ;;  %v131_v8 = vsel %vm130_vm4, %v247_v7, 0.0  ;;  %p293_p5 = scmp.ne.s32.totalorder %s233_s1, %s292_s23  ;;  %p298_p7 = scmp.lt.s32.totalorder %s292_s23, %s292_s23 }
  0x15   :  { %132 = vadd.xlane.f32.xlu0 %v131_v8  ;;  %v142_v13 = vadd.f32 %v141_v12, %v140_v11 }
  0x16   :  { %v49_v31 = vld [vmem:[#allocation2] sm:$0xf]  ;;  %p299_p8 = por %p298_p7, %p297_p6 }
  0x17   :  { %v143_v14 = vrot.slane %v142_v13, 2  ;;  %v129_v23 = vld [vmem:[#allocation3] sm:$0xf] }
  0x18   :  { %p300_p9 = pnand %p299_p8, %p293_p5 }
  0x19   :  { %199 = vadd.xlane.f32.xlu0 %v198_v9  ;;  %v144_v15 = vadd.f32 %v143_v14, %v142_v13  ;;  %v137_v18 = vld [vmem:[#allocation4] sm:$0x1] }
  0x1b   :  { %v145_v16 = vrot.slane %v144_v15, 1 }
  0x1d   :  { %v146_v17 = vadd.f32 %v145_v16, %v144_v15 }
  0x1f   :  { %v147_v19 = vadd.f32 %v146_v17, %v137_v18 }
  0x21   :  { %149 = vst.msk [vmem:[#allocation4] sm:$0x1] %vm38_vm7, %v147_v19 }
  0x28   :  { %v175_v20 = vld [vmem:[#allocation4] sm:$0x1] }
  0x29   :  { %v176_v21 = vsel %vm38_vm7, %v175_v20, 0.0 }
  0x2a   :  { %177 = vadd.xlane.f32.xlu1 %v176_v21 }
  0x9e   :  { %v133_v24 = vpop.xlane.xlu0 %132 }
  0x9f   :  { %v134_v25 = vadd.f32 %v133_v24, %v129_v23 }
  0xa1   :  { %136 = vst.msk [vmem:[#allocation3] sm:$0xf] %vm36_vm2, %v134_v25 }
  0xa2   :  { %v200_v26 = vpop.xlane.xlu0 %199 }
  0xa8   :  { %v155_v27 = vld [vmem:[#allocation3] sm:$0xf] }
  0xa9   :  { %v201_v28 = vmul.f32 %v200_v26, %v155_v27  ;;  %vm156_vm8 = vcmp.gt.f32.partialorder %v155_v27, 0.0 }
  0xaa   :  { %v166_v30 = vsel %vm156_vm8, 1, %v329_v22  ;;  %v157_v45 = vsel %vm156_vm8, %v155_v27, 1.0 }
  0xab   :  { %v202_v29 = vsel %vm36_vm2, %v201_v28, 0.0 }
  0xac   :  { %203 = vadd.xlane.f32.xlu0 %v202_v29 }
  0xb3   :  { %v178_v38 = vpop.xlane.xlu1 %177 }
  0xb4   :  { %v179_v39 = vrot.slane %v178_v38, 4 }
  0xb6   :  { %v180_v40 = vadd.f32 %v179_v39, %v178_v38 }
  0xb8   :  { %v181_v41 = vrot.slane %v180_v40, 2 }
  0xba   :  { %v182_v42 = vadd.f32 %v181_v41, %v180_v40 }
  0xbc   :  { %v183_v43 = vrot.slane %v182_v42, 1 }
  0xbe   :  { %v184_v44 = vadd.f32 %v183_v43, %v182_v42 }
  0xc0   :  { %256 = vpush %v184_v44 }
  0xc2   :  { %168 = vperm.xlu0 %269, %v166_v30  }
  0xd4   :  { %v122_v32 = vpop.f32.mrf.mxu0 }
  0xd5   :  { %v126_v33 = vadd.f32 %v122_v32, %v49_v31 }
  0xd6   :  { %v255_v34 = vpop.f32.mrf.mxu0 }
  0xd7   :  { %128 = vst.msk [vmem:[#allocation2] sm:$0xf] %vm34_vm1, %v126_v33 }
  0xde   :  { %v154_v35 = vld [vmem:[#allocation2] sm:$0xf] }
  0xdf   :  { %v186_v36 = vmul.f32 %v154_v35, %v368_v5 }
  0xe1   :  { %v187_v37 = vsel %vm34_vm1, %v186_v36, 0.0 }
  0xe2   :  { %188 = vadd.xlane.f32.xlu1 %v187_v37 }
  0xf3   :  { %160 = vperm.xlu1 %268, %v157_v45  }
 0x135   :  { %v204_v46 = vpop.xlane.xlu0 %203 }
 0x136   :  { %v205_v47 = vrot.slane %v204_v46, 4 }
 0x138   :  { %v206_v48 = vadd.f32 %v205_v47, %v204_v46 }
 0x13a   :  { %v207_v49 = vrot.slane %v206_v48, 2 }
 0x13c   :  { %v208_v54 = vadd.f32 %v207_v49, %v206_v48 }
 0x13d   :  { %v169_v62 = vpop.permute.xlu0 %168 }
 0x13e   :  { %v209_v57 = vrot.slane %v208_v54, 1  ;;  %vm170_vm9 = vcmp.eq.s32.totalorder %v169_v62, 1 }
 0x140   :  { %v210_v60 = vadd.f32 %v209_v57, %v208_v54 }
 0x16b   :  { %v189_v50 = vpop.xlane.xlu1 %188 }
 0x16c   :  { %v190_v51 = vrot.slane %v189_v50, 4 }
 0x16e   :  { %v191_v52 = vadd.f32 %v190_v51, %v189_v50 }
 0x16f   :  { %v161_v53 = vpop.permute.xlu1 %160 }
 0x170   :  { %v192_v55 = vrot.slane %v191_v52, 2  ;;  %270 = vrcp.f32 %v161_v53 }
 0x172   :  { %v193_v56 = vadd.f32 %v192_v55, %v191_v52 }
 0x174   :  { %v194_v58 = vrot.slane %v193_v56, 1 }
 0x176   :  { %v195_v59 = vadd.f32 %v194_v58, %v193_v56 }
 0x178   :  { %258 = vpush %v195_v59 }
 0x179   :  { %260 = vpush %v210_v60 }
 0x17d   :  { %v271_v61 = vpop.eup %270 }
 0x17e   :  { %v164_v63 = vmul.f32 %v271_v61, %v154_v35 }
 0x180   :  { %v165_v0 = vsub.f32 %v164_v63, %v368_v5 }
 0x182   :  { %v171_v1 = vsel %vm170_vm9, %v165_v0, 0.0 }
 0x183   :  { %v172_v2 = vmul.f32 0.1, %v171_v1 }
 0x185   :  { %v173_v3 = vadd.f32 %v172_v2, %v368_v5 }
 0x187   :  { %174 = vst.msk [vmem:[#allocation10] sm:$0xf] %vm34_vm1, %v173_v3 }
 0x188   :  { %303 = shalt.err (!%p300_p9)
}
 0x189   :  { %235 = dma.vmem_to_hbm [thread:$0]  %s233_s1, 64, %s393_s4, [#allocation7]  }
 0x18a   :  { %s257_s26 = spop %256  ;;  %s331_s7 = smov [#allocation9]  }
 0x1a9   :  { %s259_s27 = spop %258 }
 0x1aa   :  { %s212_s28 = smul.f32 2.0, %s259_s27  ;;  %s261_s30 = spop %260 }
 0x1ac   :  { %s213_s29 = ssub.f32 %s257_s26, %s212_s28 }
 0x1ae   :  { %s214_s5 = sadd.f32 %s261_s30, %s213_s29 }
 0x1b0   :  { %s215_s6 = smul.f32 0.00390625, %s214_s5 }
 0x1b2   :  { %217 = sst [smem:[#allocation9]] %s215_s6 }
 0x1b3   :  { %225 = dma.smem_to_hbm %s331_s7, 16, %s392_s3, [#allocation8]  }
 0x1b4   :  { %322 = dma.done.wait [#allocation8], 16  }
 0x1b5   :  { %323 = vsyncadd [#allocation8], 4294967280 }
 0x1b6   :  { %324 = dma.done.wait [#allocation7], 64  }
 0x1b7   :  { %325 = vsyncadd [#allocation7], 4294967232 }
 0x1b8   :  { %242 = sfence }
 0x1b9   :  { %243 = vsyncpa [#allocation6], 1 }
 0x1ba   :  { %244 = vsyncpa [#allocation7], 1 }
 0x1bb   :  { %245 = vsyncpa [#allocation8], 1 }

</bundles_post_ra>
